<compile_context>
chip_gen: v7x
topology: tpu7x:2x2x1
jax: 0.10.0
libtpu: 0.0.40
codegen_flags: <defaults>
</compile_context>

<pallas_src>
import jax
import jax.numpy as jnp
from jax.experimental import pallas as pl
from jax.experimental.pallas import tpu as pltpu

EMB_DIM_PER_Z = 8   # assumed per-categorical embedding width for EmbedNet
HID_SIZE = 100      # FusionNet hidden size (hid_size=100 in the module)
LANE = 128
V_PAD = 128         # padded multi-hot vocab width (sum(Zs) must fit in 128 lanes)


def _round_up(n, m):
    return ((n + m - 1) // m) * m


# ----------------------------- Pallas kernel ---------------------------------

def _make_kernel(offsets):
    """Build the fused kernel; `offsets` (per-categorical vocab offsets) are
    static Python ints baked into the trace."""
    offsets = tuple(int(o) for o in offsets)

    def kernel(z_ref, x_ref, m_ref, w1x_ref, b1_ref, w2_ref, b2_ref, o_ref):
        # z  : (TB, nZ)  int32            x  : (TB, dim)    f32
        # m  : (V_PAD, hid_p) bf16  (folded emb tables @ W1_emb, VMEM resident)
        # w1x: (dim, hid_p)   bf16        b1 : (1, hid_p)   f32
        # w2 : (hid_p, nb_Y)  bf16        b2 : (1, nb_Y)    f32
        # o  : (TB, nb_Y)     f32
        z = z_ref[...]
        tb = z.shape[0]
        lane = jax.lax.broadcasted_iota(jnp.int32, (tb, V_PAD), 1)
        hot = lane == (z[:, 0:1] + offsets[0])
        for i in range(1, len(offsets)):
            hot = jnp.logical_or(hot, lane == (z[:, i:i + 1] + offsets[i]))
        hot_bf = jnp.where(hot, 1.0, 0.0).astype(jnp.bfloat16)

        # h = emb(Z) @ W1_emb + x @ W1_x + b1   (f32 accumulation on MXU)
        h = jnp.dot(hot_bf, m_ref[...], preferred_element_type=jnp.float32)
        h = h + jnp.dot(x_ref[...].astype(jnp.bfloat16), w1x_ref[...],
                        preferred_element_type=jnp.float32)
        h = jnp.maximum(h + b1_ref[...], 0.0)          # f32 epilogue (v5e-safe)
        y = jnp.dot(h.astype(jnp.bfloat16), w2_ref[...],
                    preferred_element_type=jnp.float32)
        o_ref[...] = (y + b2_ref[...]).astype(o_ref.dtype)

    return kernel


# ------------------------- Parameter preparation -----------------------------

def init_linear_z_head(key, dim, nb_Y, Zs):
    """Deterministic synthetic parameters (shapes implied by the module __init__)."""
    keys = jax.random.split(key, len(Zs) + 4)
    params = {}
    params["emb_tables"] = [
        jax.random.normal(keys[i], (Zs[i], EMB_DIM_PER_Z), jnp.float32) * 0.1
        for i in range(len(Zs))
    ]
    emb_dim = EMB_DIM_PER_Z * len(Zs)
    in_dim = emb_dim + dim
    k1, k2, k3, k4 = keys[-4:]
    params["w1"] = jax.random.normal(k1, (in_dim, HID_SIZE), jnp.float32) / in_dim ** 0.5
    params["b1"] = jax.random.normal(k2, (HID_SIZE,), jnp.float32) * 0.01
    params["w2"] = jax.random.normal(k3, (HID_SIZE, nb_Y), jnp.float32) / HID_SIZE ** 0.5
    params["b2"] = jax.random.normal(k4, (nb_Y,), jnp.float32) * 0.01
    return params


def prepare_linear_z_head(params, *, compute_dtype=jnp.bfloat16):
    """One-time weight preprocessing: fold embedding tables through their W1
    rows, pad hid to 128 lanes, cast MXU operands to bf16.  Runs once at init,
    never on the forward path."""
    tables = params["emb_tables"]
    w1, b1, w2, b2 = params["w1"], params["b1"], params["w2"], params["b2"]
    emb_dim = sum(t.shape[1] for t in tables)
    hid = w1.shape[1]
    nb_Y = w2.shape[1]
    hid_p = _round_up(hid, LANE)

    w1e = w1[:emb_dim]          # rows multiplying the embedding part of the cat
    w1x = w1[emb_dim:]          # rows multiplying the raw input

    m_parts, offsets = [], []
    row, off = 0, 0
    for t in tables:
        d = t.shape[1]
        m_parts.append(t @ w1e[row:row + d])     # (vocab_i, hid) f32
        offsets.append(off)
        row += d
        off += t.shape[0]
    vocab = off
    assert vocab <= V_PAD, "sum(Zs) must fit in one 128-lane multi-hot"
    # TODO(synk): generalize to sum(Zs) > 128 by splitting the multi-hot.
    m_all = jnp.concatenate(m_parts, axis=0)     # (vocab, hid)

    # Zero-padding scheme: padded m_all rows are zero (never selected for valid
    # Z anyway), padded hid columns stay zero through bias+ReLU and hit
    # zero-padded w2 rows, so they contribute nothing.
    return {
        "m_all": jnp.pad(m_all, ((0, V_PAD - vocab), (0, hid_p - hid))
                         ).astype(compute_dtype),
        "w1x": jnp.pad(w1x, ((0, 0), (0, hid_p - hid))).astype(compute_dtype),
        "b1": jnp.pad(b1, (0, hid_p - hid)).astype(jnp.float32).reshape(1, hid_p),
        "w2": jnp.pad(w2, ((0, hid_p - hid), (0, 0))).astype(compute_dtype),
        "b2": b2.astype(jnp.float32).reshape(1, nb_Y),
        "offsets": tuple(offsets),
        "nb_Y": nb_Y,
        "dim": w1x.shape[0],
        "hid_p": hid_p,
    }


# ----------------------------- Forward (Pallas) -------------------------------

def linear_z_head_forward(prep, x, Z, *, tile_b=None):
    """forward(input, Z) = FusionNet(cat([EmbedNet(Z), input], -1)), fully fused."""
    B, dim = x.shape
    nZ = Z.shape[1]
    nb_Y = prep["nb_Y"]
    hid_p = prep["hid_p"]
    assert dim == prep["dim"]

    if tile_b is None:
        # Large tiles amortize the ~0.35us/grid-step overhead; 2048 rows of
        # double-buffered (Z int32 + x f32 + out f32) is < 1 MiB of VMEM.
        tile_b = min(2048, _round_up(B, 8))
    grid = (pl.cdiv(B, tile_b),)

    kernel = _make_kernel(prep["offsets"])

    flops = 2 * B * ((V_PAD + dim) * hid_p + hid_p * nb_Y)
    bytes_accessed = (B * nZ * 4 + B * dim * 4 + B * nb_Y * 4
                      + (V_PAD + dim) * hid_p * 2 + hid_p * nb_Y * 2
                      + (hid_p + nb_Y) * 4)

    return pl.pallas_call(
        kernel,
        out_shape=jax.ShapeDtypeStruct((B, nb_Y), jnp.float32),
        grid=grid,
        in_specs=[
            pl.BlockSpec((tile_b, nZ), lambda i: (i, 0)),      # Z tile (int32)
            pl.BlockSpec((tile_b, dim), lambda i: (i, 0)),     # x tile (f32)
            pl.BlockSpec((V_PAD, hid_p), lambda i: (0, 0)),    # folded emb (resident)
            pl.BlockSpec((dim, hid_p), lambda i: (0, 0)),      # w1x (resident)
            pl.BlockSpec((1, hid_p), lambda i: (0, 0)),        # b1  (resident)
            pl.BlockSpec((hid_p, nb_Y), lambda i: (0, 0)),     # w2  (resident)
            pl.BlockSpec((1, nb_Y), lambda i: (0, 0)),         # b2  (resident)
        ],
        out_specs=pl.BlockSpec((tile_b, nb_Y), lambda i: (i, 0)),
        compiler_params=pltpu.CompilerParams(
            dimension_semantics=("parallel",)),
        cost_estimate=pl.CostEstimate(
            flops=int(flops), transcendentals=0,
            bytes_accessed=int(bytes_accessed)),
    )(Z, x, prep["m_all"], prep["w1x"], prep["b1"], prep["w2"], prep["b2"])


# ----------------------------- Reference --------------------------------------

def _reference_forward(prep, x, Z):
    """Pure-JAX reference with the same folded-table / bf16-operand math."""
    offs = jnp.asarray(prep["offsets"], jnp.int32)
    m = prep["m_all"].astype(jnp.float32)             # (V_PAD, hid_p)
    e_h = m[Z + offs[None, :]].sum(axis=1)            # (B, hid_p)
    h = e_h + jnp.dot(x.astype(jnp.bfloat16), prep["w1x"],
                      preferred_element_type=jnp.float32)
    h = jnp.maximum(h + prep["b1"], 0.0)
    y = jnp.dot(h.astype(jnp.bfloat16), prep["w2"],
                preferred_element_type=jnp.float32) + prep["b2"]
    return y


# ----------------------------------- main -------------------------------------

if __name__ == "__main__":
    dim, nb_Y = 32, 4
    Zs = (5, 7, 11)
    B = 32

    key = jax.random.PRNGKey(0)
    kp, kx, kz = jax.random.split(key, 3)

    params = init_linear_z_head(kp, dim, nb_Y, Zs)
    prep = prepare_linear_z_head(params)        # one-time weight preprocessing

    x = jax.random.normal(kx, (B, dim), jnp.float32)
    zkeys = jax.random.split(kz, len(Zs))
    Z = jnp.stack([jax.random.randint(zkeys[i], (B,), 0, Zs[i])
                   for i in range(len(Zs))], axis=-1).astype(jnp.int32)

    # Default path (single large tile) and a forced multi-step grid path.
    out = jax.block_until_ready(linear_z_head_forward(prep, x, Z))
    out_tiled = jax.block_until_ready(linear_z_head_forward(prep, x, Z, tile_b=8))

    ref = _reference_forward(prep, x, Z)
    assert out.shape == (B, nb_Y)
    assert jnp.allclose(out, ref, atol=2e-3, rtol=2e-3), (
        f"max abs err = {jnp.max(jnp.abs(out - ref))}")
    assert jnp.allclose(out_tiled, ref, atol=2e-3, rtol=2e-3), (
        f"max abs err (tiled) = {jnp.max(jnp.abs(out_tiled - ref))}")

    print("KERNEL_OK")
</pallas_src>

<mosaic_0001>
module attributes {stable_mosaic.version = 11 : i64} {
  func.func @kernel(%arg0: i32, %arg1: memref<32x3xi32, #tpu.memory_space<vmem>>, %arg2: memref<32x32xf32, #tpu.memory_space<vmem>>, %arg3: memref<128x128xbf16, #tpu.memory_space<vmem>>, %arg4: memref<32x128xbf16, #tpu.memory_space<vmem>>, %arg5: memref<1x128xf32, #tpu.memory_space<vmem>>, %arg6: memref<128x4xbf16, #tpu.memory_space<vmem>>, %arg7: memref<1x4xf32, #tpu.memory_space<vmem>>, %arg8: memref<32x4xf32, #tpu.memory_space<vmem>>) attributes {dimension_semantics = [#tpu.dimension_semantics<parallel>], iteration_bounds = array<i64: 1>, scalar_prefetch = 0 : i64, scratch_operands = 0 : i64, tpu.core_type = #tpu.core_type<tc>, window_params = [{transform_indices = @transform_0, window_bounds = array<i64: 32, 3>}, {transform_indices = @transform_1, window_bounds = array<i64: 32, 32>}, {pipeline_mode = #tpu.pipeline_mode<synchronous>, transform_indices = @transform_2, window_bounds = array<i64: 128, 128>}, {pipeline_mode = #tpu.pipeline_mode<synchronous>, transform_indices = @transform_3, window_bounds = array<i64: 32, 128>}, {pipeline_mode = #tpu.pipeline_mode<synchronous>, transform_indices = @transform_4, window_bounds = array<i64: 1, 128>}, {pipeline_mode = #tpu.pipeline_mode<synchronous>, transform_indices = @transform_5, window_bounds = array<i64: 128, 4>}, {pipeline_mode = #tpu.pipeline_mode<synchronous>, transform_indices = @transform_6, window_bounds = array<i64: 1, 4>}, {transform_indices = @transform_7, window_bounds = array<i64: 32, 4>}]} {
    %c0 = arith.constant 0 : index
    %c0_0 = arith.constant 0 : index
    %0 = vector.load %arg1[%c0, %c0_0] : memref<32x3xi32, #tpu.memory_space<vmem>>, vector<32x3xi32>
    %1 = tpu.iota {dimensions = array<i32: 1>} : vector<32x128xi32>
    %2 = vector.extract_strided_slice %0 {offsets = [0, 0], sizes = [32, 1], strides = [1, 1]} : vector<32x3xi32> to vector<32x1xi32>
    %c0_i32 = arith.constant 0 : i32
    %3 = vector.broadcast %c0_i32 : i32 to vector<32x1xi32>
    %4 = arith.addi %2, %3 : vector<32x1xi32>
    %5 = vector.broadcast %4 : vector<32x1xi32> to vector<32x128xi32>
    %6 = arith.cmpi eq, %1, %5 : vector<32x128xi32>
    %7 = vector.extract_strided_slice %0 {offsets = [0, 1], sizes = [32, 1], strides = [1, 1]} : vector<32x3xi32> to vector<32x1xi32>
    %c5_i32 = arith.constant 5 : i32
    %8 = vector.broadcast %c5_i32 : i32 to vector<32x1xi32>
    %9 = arith.addi %7, %8 : vector<32x1xi32>
    %10 = vector.broadcast %9 : vector<32x1xi32> to vector<32x128xi32>
    %11 = arith.cmpi eq, %1, %10 : vector<32x128xi32>
    %12 = arith.ori %6, %11 : vector<32x128xi1>
    %13 = vector.extract_strided_slice %0 {offsets = [0, 2], sizes = [32, 1], strides = [1, 1]} : vector<32x3xi32> to vector<32x1xi32>
    %c12_i32 = arith.constant 12 : i32
    %14 = vector.broadcast %c12_i32 : i32 to vector<32x1xi32>
    %15 = arith.addi %13, %14 : vector<32x1xi32>
    %16 = vector.broadcast %15 : vector<32x1xi32> to vector<32x128xi32>
    %17 = arith.cmpi eq, %1, %16 : vector<32x128xi32>
    %18 = arith.ori %12, %17 : vector<32x128xi1>
    %cst = arith.constant 1.000000e+00 : f32
    %cst_1 = arith.constant 0.000000e+00 : f32
    %19 = vector.broadcast %cst : f32 to vector<32x128xf32>
    %20 = vector.broadcast %cst_1 : f32 to vector<32x128xf32>
    %21 = arith.select %18, %19, %20 : vector<32x128xi1>, vector<32x128xf32>
    %22 = arith.truncf %21 : vector<32x128xf32> to vector<32x128xbf16>
    %c0_2 = arith.constant 0 : index
    %c0_3 = arith.constant 0 : index
    %23 = vector.load %arg3[%c0_2, %c0_3] : memref<128x128xbf16, #tpu.memory_space<vmem>>, vector<128x128xbf16>
    %cst_4 = arith.constant dense<0.000000e+00> : vector<32x128xf32>
    %24 = tpu.matmul %22, %23, %cst_4 {dimension_numbers = #tpu.dot_dimension_numbers<[1], [0], [0], [1], [0, 0, 1, 1], [], []>} : vector<32x128xbf16>, vector<128x128xbf16>, vector<32x128xf32> -> vector<32x128xf32>
    %c0_5 = arith.constant 0 : index
    %c0_6 = arith.constant 0 : index
    %25 = vector.load %arg2[%c0_5, %c0_6] : memref<32x32xf32, #tpu.memory_space<vmem>>, vector<32x32xf32>
    %26 = arith.truncf %25 : vector<32x32xf32> to vector<32x32xbf16>
    %c0_7 = arith.constant 0 : index
    %c0_8 = arith.constant 0 : index
    %27 = vector.load %arg4[%c0_7, %c0_8] : memref<32x128xbf16, #tpu.memory_space<vmem>>, vector<32x128xbf16>
    %cst_9 = arith.constant dense<0.000000e+00> : vector<32x128xf32>
    %28 = tpu.matmul %26, %27, %cst_9 {dimension_numbers = #tpu.dot_dimension_numbers<[1], [0], [0], [1], [0, 0, 1, 1], [], []>} : vector<32x32xbf16>, vector<32x128xbf16>, vector<32x128xf32> -> vector<32x128xf32>
    %29 = arith.addf %24, %28 : vector<32x128xf32>
    %c0_10 = arith.constant 0 : index
    %c0_11 = arith.constant 0 : index
    %30 = vector.load %arg5[%c0_10, %c0_11] : memref<1x128xf32, #tpu.memory_space<vmem>>, vector<1x128xf32>
    %31 = vector.broadcast %30 : vector<1x128xf32> to vector<32x128xf32>
    %32 = arith.addf %29, %31 : vector<32x128xf32>
    %cst_12 = arith.constant 0.000000e+00 : f32
    %33 = vector.broadcast %cst_12 : f32 to vector<32x128xf32>
    %34 = arith.maximumf %32, %33 : vector<32x128xf32>
    %35 = arith.truncf %34 : vector<32x128xf32> to vector<32x128xbf16>
    %c0_13 = arith.constant 0 : index
    %c0_14 = arith.constant 0 : index
    %36 = vector.load %arg6[%c0_13, %c0_14] : memref<128x4xbf16, #tpu.memory_space<vmem>>, vector<128x4xbf16>
    %cst_15 = arith.constant dense<0.000000e+00> : vector<32x4xf32>
    %37 = tpu.matmul %35, %36, %cst_15 {dimension_numbers = #tpu.dot_dimension_numbers<[1], [0], [0], [1], [0, 0, 1, 1], [], []>} : vector<32x128xbf16>, vector<128x4xbf16>, vector<32x4xf32> -> vector<32x4xf32>
    %c0_16 = arith.constant 0 : index
    %c0_17 = arith.constant 0 : index
    %38 = vector.load %arg7[%c0_16, %c0_17] : memref<1x4xf32, #tpu.memory_space<vmem>>, vector<1x4xf32>
    %39 = vector.broadcast %38 : vector<1x4xf32> to vector<32x4xf32>
    %40 = arith.addf %37, %39 : vector<32x4xf32>
    %c0_18 = arith.constant 0 : index
    %c0_19 = arith.constant 0 : index
    %41 = vector.load %arg8[%c0_18, %c0_19] : memref<32x4xf32, #tpu.memory_space<vmem>>, vector<32x4xf32>
    tpu.vector_store %arg8[%c0_18, %c0_19], %40 {strides = array<i32>} : memref<32x4xf32, #tpu.memory_space<vmem>>, vector<32x4xf32>,
    return
  }
  func.func @transform_0(%arg0: i32) -> (i32, i32) {
    %c0_i32 = arith.constant 0 : i32
    %c0_i32_0 = arith.constant 0 : i32
    return %arg0, %c0_i32 : i32, i32
  }
  func.func @transform_1(%arg0: i32) -> (i32, i32) {
    %c0_i32 = arith.constant 0 : i32
    %c0_i32_0 = arith.constant 0 : i32
    return %arg0, %c0_i32 : i32, i32
  }
  func.func @transform_2(%arg0: i32) -> (i32, i32) {
    %c0_i32 = arith.constant 0 : i32
    %c0_i32_0 = arith.constant 0 : i32
    %c0_i32_1 = arith.constant 0 : i32
    return %c0_i32, %c0_i32_0 : i32, i32
  }
  func.func @transform_3(%arg0: i32) -> (i32, i32) {
    %c0_i32 = arith.constant 0 : i32
    %c0_i32_0 = arith.constant 0 : i32
    %c0_i32_1 = arith.constant 0 : i32
    return %c0_i32, %c0_i32_0 : i32, i32
  }
  func.func @transform_4(%arg0: i32) -> (i32, i32) {
    %c0_i32 = arith.constant 0 : i32
    %c0_i32_0 = arith.constant 0 : i32
    %c0_i32_1 = arith.constant 0 : i32
    return %c0_i32, %c0_i32_0 : i32, i32
  }
  func.func @transform_5(%arg0: i32) -> (i32, i32) {
    %c0_i32 = arith.constant 0 : i32
    %c0_i32_0 = arith.constant 0 : i32
    %c0_i32_1 = arith.constant 0 : i32
    return %c0_i32, %c0_i32_0 : i32, i32
  }
  func.func @transform_6(%arg0: i32) -> (i32, i32) {
    %c0_i32 = arith.constant 0 : i32
    %c0_i32_0 = arith.constant 0 : i32
    %c0_i32_1 = arith.constant 0 : i32
    return %c0_i32, %c0_i32_0 : i32, i32
  }
  func.func @transform_7(%arg0: i32) -> (i32, i32) {
    %c0_i32 = arith.constant 0 : i32
    %c0_i32_0 = arith.constant 0 : i32
    return %arg0, %c0_i32 : i32, i32
  }
}

</mosaic_0001>

<bundles_post_ra>
// kernel: tpu_custom_call.1
= control target key start
LH: loop header
LB: loop body
LE: loop exit
PB: predicated region body
PF: predicated region fallthrough
CT: control target
= control target key end

     0   :  { %v571_v0 = vmov 0   ;;  %v572_v2 = vmov 1   ;;  %vm141_vm0 = vcmask 261120   ;;  %v573_v23 = vmov 2   ;;  %s713_s0 = inlined_call_operand.vmem [shape: s32[32,3], index: 0, kind: input, shape index: {}]   ;;  %s714_s3 = inlined_call_operand.vmem [shape: bf16[32,128], index: 3, kind: input, shape index: {}]   ;;  %s715_s1 = inlined_call_operand.vmem [shape: f32[32,32], index: 1, kind: input, shape index: {}]   ;;  %s716_s2 = inlined_call_operand.vmem [shape: bf16[128,128], index: 2, kind: input, shape index: {}]   ;;  %s717_s5 = inlined_call_operand.vmem [shape: bf16[128,4], index: 5, kind: input, shape index: {}]   ;;  %s718_s4 = inlined_call_operand.vmem [shape: f32[1,128], index: 4, kind: input, shape index: {}]   ;;  %s719_s6 = inlined_call_operand.vmem [shape: f32[1,4], index: 6, kind: input, shape index: {}]   ;;  %s720_s7 = inlined_call_operand.vmem [shape: f32[32,4], index: 7, kind: output, shape index: {}]  }
   0x1   :  { %546 = vset.pattern.permute.xlu0 %v571_v0  ;;  %v27_v1 = vld [vmem:[%s713_s0] sm:$0xff]  ;;  %547 = vset.pattern.permute.xlu1 %v572_v2  ;;  %v28_v3 = vld [vmem:[%s713_s0 + $0x8] sm:$0xff]  ;;  %v29_v7 = vld [vmem:[%s713_s0 + $0x10] sm:$0xff]  ;;  %v31_v42 = vlaneseq  ;;  %v574_v49 = vmov 1.0|1.0  }
   0x2   :  { %34 = vperm.xlu0 %546, %v27_v1   ;;  %v49_v4 = vadd.s32 5, %v27_v1  ;;  %v553_v5 = vld [vmem:[%s714_s3] sm:$0xff]   ;;  %v50_v6 = vadd.s32 5, %v28_v3  ;;  %v554_v8 = vld [vmem:[%s714_s3 + $0x8] sm:$0xff]   ;;  %v121_v13 = vld [vmem:[%s715_s1 + $0x10] sm:$0xff]  ;;  %v51_v17 = vadd.s32 5, %v29_v7 }
   0x3   :  { %490 = vmatprep.subr.bf16.mxu0 %v553_v5  ;;  %v119_v9 = vld [vmem:[%s715_s1] sm:$0xff]  ;;  %v120_v10 = vld [vmem:[%s715_s1 + $0x8] sm:$0xff]  ;;  %v122_v14 = vld [vmem:[%s715_s1 + $0x18] sm:$0xff]  ;;  %v74_v21 = vadd.s32 12, %v28_v3  ;;  %v73_v24 = vadd.s32 12, %v27_v1  ;;  %v75_v26 = vadd.s32 12, %v29_v7 }
   0x4   :  { %54 = vperm.xlu1 %547, %v49_v4   ;;  %491 = vmatpush3.bf16.msra.mxu0 %v553_v5  ;;  %v123_v11 = vpack.c.bf16 %v120_v10, %v119_v9  ;;  %v555_v12 = vld [vmem:[%s716_s2] sm:$0xff]   ;;  %v30_v15 = vld [vmem:[%s713_s0 + $0x18] sm:$0xff]  ;;  %v124_v16 = vpack.c.bf16 %v122_v14, %v121_v13  ;;  %v556_v18 = vld [vmem:[%s716_s2 + $0x8] sm:$0xff]   ;;  %v32_v44 = vand.u32 127, %v31_v42 }
   0x5   :  { %492 = vmatprep.subr.bf16.mxu0 %v554_v8  ;;  %v52_v19 = vadd.s32 5, %v30_v15  ;;  %v557_v20 = vld [vmem:[%s716_s2 + $0x10] sm:$0xff]   ;;  %v558_v22 = vld [vmem:[%s716_s2 + $0x18] sm:$0xff]   ;;  %v559_v25 = vld [vmem:[%s716_s2 + $0x20] sm:$0xff]   ;;  %v76_v28 = vadd.s32 12, %v30_v15 }
   0x6   :  { %37 = vperm.xlu0 %546, %v28_v3   ;;  %494 = vmatprep.mubr.msk.bf16.mxu0 %vm141_vm0, %v123_v11  ;;  %v560_v27 = vld [vmem:[%s716_s2 + $0x28] sm:$0xff]   ;;  %v561_v29 = vld [vmem:[%s716_s2 + $0x30] sm:$0xff]   ;;  %v562_v30 = vld [vmem:[%s716_s2 + $0x38] sm:$0xff]  }
   0x7   :  { %v563_v31 = vld [vmem:[%s717_s5] sm:$0xff]   ;;  %v564_v32 = vld [vmem:[%s717_s5 + $0x8] sm:$0xff]   ;;  %v565_v33 = vld [vmem:[%s717_s5 + $0x10] sm:$0xff]  }
   0x8   :  { %57 = vperm.xlu1 %547, %v50_v6   ;;  %493 = vmatpush3.bf16.msra.mxu0 %v554_v8  ;;  %v566_v34 = vld [vmem:[%s717_s5 + $0x18] sm:$0xff]   ;;  %v567_v35 = vld [vmem:[%s717_s5 + $0x20] sm:$0xff]   ;;  %v568_v36 = vld [vmem:[%s717_s5 + $0x28] sm:$0xff]  }
   0x9   :  { %498 = vmatprep.subr.bf16.mxu0 %v555_v12  ;;  %518 = vmatprep.subr.bf16.mxu1 %v563_v31  ;;  %v569_v52 = vld [vmem:[%s717_s5 + $0x30] sm:$0xff]   ;;  %v570_v53 = vld [vmem:[%s717_s5 + $0x38] sm:$0xff]   ;;  %v456_v54 = vld [vmem:[%s718_s4] ss:$0 sm:$0xff] }
   0xa   :  { %40 = vperm.xlu0 %546, %v29_v7   ;;  %519 = vmatpush3.bf16.msra.mxu1 %v563_v31  ;;  %v457_v5 = vld [vmem:[%s719_s6] ss:$0 sm:$0xff] }
   0xb   :  { %495 = vmatmul.mubr.msk.bf16.vlgmr.msra.gmra.mrb[0].mxu0 %vm141_vm0, %v124_v16  ;;  %520 = vmatprep.subr.bf16.mxu1 %v564_v32 }
   0xc   :  { %548 = vset.pattern.permute.xlu1 %v571_v0  ;;  %499 = vmatpush3.bf16.msra.mxu0 %v555_v12 }
   0xd   :  { %43 = vperm.xlu1 %548, %v30_v15   ;;  %500 = vmatprep.subr.bf16.mxu0 %v556_v18 }
   0xe   :  { %549 = vset.pattern.permute.xlu0 %v572_v2  ;;  %521 = vmatpush3.bf16.msra.mxu1 %v564_v32 }
   0xf   :  { %60 = vperm.xlu0 %549, %v51_v17   ;;  %522 = vmatprep.subr.bf16.mxu1 %v565_v33 }
  0x10   :  { %501 = vmatpush3.bf16.msra.mxu0 %v556_v18 }
  0x11   :  { %550 = vset.pattern.permute.xlu1 %v572_v2  ;;  %502 = vmatprep.subr.bf16.mxu0 %v557_v20 }
  0x12   :  { %63 = vperm.xlu1 %550, %v52_v19   ;;  %523 = vmatpush3.bf16.msra.mxu1 %v565_v33 }
  0x13   :  { %552 = vset.pattern.permute.xlu0 %v573_v23  ;;  %524 = vmatprep.subr.bf16.mxu1 %v566_v34 }
  0x14   :  { %81 = vperm.xlu0 %552, %v74_v21   ;;  %503 = vmatpush3.bf16.msra.mxu0 %v557_v20 }
  0x15   :  { %504 = vmatprep.subr.bf16.mxu0 %v558_v22 }
  0x16   :  { %551 = vset.pattern.permute.xlu1 %v573_v23  ;;  %525 = vmatpush3.bf16.msra.mxu1 %v566_v34 }
  0x17   :  { %78 = vperm.xlu1 %551, %v73_v24   ;;  %526 = vmatprep.subr.bf16.mxu1 %v567_v35 }
  0x18   :  { %505 = vmatpush3.bf16.msra.mxu0 %v558_v22 }
  0x19   :  { %506 = vmatprep.subr.bf16.mxu0 %v559_v25 }
  0x1a   :  { %527 = vmatpush3.bf16.msra.mxu1 %v567_v35 }
  0x1b   :  { %84 = vperm.xlu1 %551, %v75_v26   ;;  %528 = vmatprep.subr.bf16.mxu1 %v568_v36 }
  0x1c   :  { %507 = vmatpush3.bf16.msra.mxu0 %v559_v25 }
  0x1d   :  { %508 = vmatprep.subr.bf16.mxu0 %v560_v27 }
  0x1e   :  { %529 = vmatpush3.bf16.msra.mxu1 %v568_v36 }
  0x1f   :  { %87 = vperm.xlu1 %551, %v76_v28   ;;  %530 = vmatprep.subr.bf16.mxu1 %v569_v52 }
  0x20   :  { %509 = vmatpush3.bf16.msra.mxu0 %v560_v27 }
  0x21   :  { %510 = vmatprep.subr.bf16.mxu0 %v561_v29 }
  0x22   :  { %531 = vmatpush3.bf16.msra.mxu1 %v569_v52 }
  0x23   :  { %532 = vmatprep.subr.bf16.mxu1 %v570_v53 }
  0x24   :  { %511 = vmatpush3.bf16.msra.mxu0 %v561_v29 }
  0x25   :  { %512 = vmatprep.subr.bf16.mxu0 %v562_v30 }
  0x26   :  { %533 = vmatpush3.bf16.msra.mxu1 %v570_v53 }
  0x28   :  { %513 = vmatpush3.bf16.msra.mxu0 %v562_v30 }
  0x81   :  { %v35_v37 = vpop.permute.xlu0 %34 }
  0x82   :  { %vm45_vm1 = vcmp.eq.s32.totalorder %v32_v44, %v35_v37 }
  0x83   :  { %v55_v38 = vpop.permute.xlu1 %54 }
  0x84   :  { %vm65_vm2 = vcmp.eq.s32.totalorder %v32_v44, %v55_v38 }
  0x85   :  { %v38_v39 = vpop.permute.xlu0 %37  ;;  %vm69_vm6 = vmor %vm45_vm1, %vm65_vm2 }
  0x86   :  { %vm46_vm3 = vcmp.eq.s32.totalorder %v32_v44, %v38_v39 }
  0x87   :  { %v58_v40 = vpop.permute.xlu1 %57 }
  0x88   :  { %vm66_vm4 = vcmp.eq.s32.totalorder %v32_v44, %v58_v40 }
  0x89   :  { %v41_v41 = vpop.permute.xlu0 %40  ;;  %vm70_vm7 = vmor %vm46_vm3, %vm66_vm4 }
  0x8a   :  { %vm47_vm14 = vcmp.eq.s32.totalorder %v32_v44, %v41_v41 }
  0x8c   :  { %v44_v43 = vpop.permute.xlu1 %43 }
  0x8d   :  { %vm48_vm0 = vcmp.eq.s32.totalorder %v32_v44, %v44_v43 }
  0x8e   :  { %v61_v45 = vpop.permute.xlu0 %60 }
  0x8f   :  { %vm67_vm12 = vcmp.eq.s32.totalorder %v32_v44, %v61_v45 }
  0x90   :  { %vm71_vm1 = vmor %vm47_vm14, %vm67_vm12 }
  0x91   :  { %v64_v46 = vpop.permute.xlu1 %63 }
  0x92   :  { %vm68_vm13 = vcmp.eq.s32.totalorder %v32_v44, %v64_v46 }
  0x93   :  { %v82_v47 = vpop.permute.xlu0 %81  ;;  %vm72_vm2 = vmor %vm48_vm0, %vm68_vm13 }
  0x94   :  { %vm90_vm5 = vcmp.eq.s32.totalorder %v32_v44, %v82_v47 }
  0x95   :  { %vm94_vm8 = vmor %vm70_vm7, %vm90_vm5 }
  0x96   :  { %v79_v48 = vpop.permute.xlu1 %78 }
  0x97   :  { %vm89_vm9 = vcmp.eq.s32.totalorder %v32_v44, %v79_v48 }
  0x98   :  { %vm93_vm10 = vmor %vm69_vm6, %vm89_vm9  ;;  %vm431_vm6 = vcmask 31744  }
  0x99   :  { %vm452_vm11 = vmpackc.low %vm94_vm8, %vm93_vm10 }
  0x9a   :  { %514 = vmatprep.mubr.msk.bf16.mxu0 %vm452_vm11, %v574_v49  ;;  %v85_v50 = vpop.permute.xlu1 %84 }
  0x9b   :  { %vm91_vm15 = vcmp.eq.s32.totalorder %v32_v44, %v85_v50 }
  0x9c   :  { %vm95_vm3 = vmor %vm71_vm1, %vm91_vm15 }
  0x9e   :  { %v88_v51 = vpop.permute.xlu1 %87 }
  0x9f   :  { %vm92_vm4 = vcmp.eq.s32.totalorder %v32_v44, %v88_v51 }
  0xa0   :  { %vm96_vm5 = vmor %vm72_vm2, %vm92_vm4 }
  0xa1   :  { %vm454_vm7 = vmpackc.low %vm96_vm5, %vm95_vm3 }
  0xa2   :  { %515 = vmatmul.mubr.msk.bf16.vlgmr.msra.gmra.mrb[0].mxu0 %vm454_vm7, %v574_v49 }
 0x175   :  { %v516_v55 = vpop.f32.mrb[0].mxu0 }
 0x176   :  { %v303_v56 = vadd.f32 %v516_v55, %v456_v54  ;;  %v279_v57 = vpop.f32.mrb[1].mxu0 }
 0x177   :  { %v301_v58 = vadd.f32 %v456_v54, %v279_v57  ;;  %v517_v59 = vpop.f32.mrb[2].mxu0 }
 0x178   :  { %v304_v60 = vadd.f32 %v517_v59, %v456_v54  ;;  %v282_v61 = vpop.f32.mrb[3].mxu0  ;;  %v307_v63 = vmax.f32 %v303_v56, 0.0 }
 0x179   :  { %v302_v62 = vadd.f32 %v456_v54, %v282_v61  ;;  %v305_v1 = vmax.f32 %v301_v58, 0.0 }
 0x17a   :  { %v308_v0 = vmax.f32 %v304_v60, 0.0 }
 0x17b   :  { %v306_v2 = vmax.f32 %v302_v62, 0.0 }
 0x17c   :  { %v310_v3 = vpack.c.bf16 %v308_v0, %v307_v63 }
 0x17d   :  { %v309_v4 = vpack.c.bf16 %v306_v2, %v305_v1 }
 0x17f   :  { %534 = vmatprep.mubr.bf16.mxu1 %v309_v4 }
 0x180   :  { %535 = vmatmul.mubr.bf16.vlgmr.msra.gmra.mrb[0].mxu1 %v310_v3 }
 0x253   :  { %v536_v6 = vpop.f32.mrb[0].mxu1 }
 0x254   :  { %v425_v7 = vadd.f32 %v536_v6, %v457_v5  ;;  %v416_v8 = vpop.f32.mrb[1].mxu1 }
 0x255   :  { %v417_v9 = vadd.f32 %v457_v5, %v416_v8  ;;  %v537_v10 = vpop.f32.mrb[2].mxu1 }
 0x256   :  { %434 = vst.msk [vmem:[%s720_s7 + $0x10] sm:$0xff] %vm431_vm6, %v425_v7  ;;  %v428_v11 = vadd.f32 %v537_v10, %v457_v5  ;;  %v419_v12 = vpop.f32.mrb[3].mxu1 }
 0x257   :  { %432 = vst.msk [vmem:[%s720_s7] sm:$0xff] %vm431_vm6, %v417_v9  ;;  %v420_v13 = vadd.f32 %v457_v5, %v419_v12 }
 0x258   :  { %435 = vst.msk [vmem:[%s720_s7 + $0x18] sm:$0xff] %vm431_vm6, %v428_v11 }
 0x259   :  { %433 = vst.msk [vmem:[%s720_s7 + $0x8] sm:$0xff] %vm431_vm6, %v420_v13 }

</bundles_post_ra>
